<compile_context>
chip_gen: v7x
topology: tpu7x:2x2x1
jax: 0.10.0
libtpu: 0.0.40
codegen_flags: <defaults>
</compile_context>

<pallas_src>
import jax
import jax.numpy as jnp
from jax.experimental import pallas as pl
from jax.experimental.pallas import tpu as pltpu

IN_FEATURES = 81 * 2 * 3   # 486
HIDDEN = 200
OUT_FEATURES = 4 * 3       # 12

# Padded, hardware-friendly sizes.
K_PAD = 512                # 486 -> 512  (multiple of 128, lines up with MXU K)
H_PAD = 256                # 200 -> 256  (multiple of 128)
N_PAD = 128                # 12  -> 128  (one full lane group -> unmasked vst)
M_MIN = 8                  # pad batch/rows to a multiple of 8 sublanes


def _mlp_kernel(x_ref, w1_ref, b1_ref, w2_ref, b2_ref, o_ref):
    # x_ref:  (Mp, 512)  bf16
    # w1_ref: (512, 256) bf16      b1_ref: (1, 256) f32
    # w2_ref: (256, 128) bf16      b2_ref: (1, 128) f32
    # o_ref:  (Mp, 128)  f32
    x = x_ref[...]
    h = jnp.dot(x, w1_ref[...], preferred_element_type=jnp.float32) + b1_ref[...]
    h = jnp.maximum(h, 0.0)                                   # ReLU in f32
    y = jnp.dot(h.astype(jnp.bfloat16), w2_ref[...],
                preferred_element_type=jnp.float32) + b2_ref[...]
    o_ref[...] = y                                            # already f32


def _pad2(a, rows, cols):
    r, c = a.shape
    return jnp.pad(a, ((0, rows - r), (0, cols - c)))


def prepare_params(w1, b1, w2, b2):
    """One-time parameter prep: zero-pad to hardware tiles and cast weights to bf16.

    w1: (486, 200)  b1: (200,)   w2: (200, 12)  b2: (12,)
    """
    w1p = _pad2(jnp.asarray(w1, jnp.float32), K_PAD, H_PAD).astype(jnp.bfloat16)
    w2p = _pad2(jnp.asarray(w2, jnp.float32), H_PAD, N_PAD).astype(jnp.bfloat16)
    b1p = _pad2(jnp.asarray(b1, jnp.float32).reshape(1, HIDDEN), 1, H_PAD)
    b2p = _pad2(jnp.asarray(b2, jnp.float32).reshape(1, OUT_FEATURES), 1, N_PAD)
    return w1p, b1p, w2p, b2p


def net_forward(x, params):
    """Pallas equivalent of Net.forward.

    x: a single sample with 486 elements (e.g. (81, 2, 3)) -> returns (1, 12),
       or a batch (B, 486) -> returns (B, 12).
    params: output of prepare_params (padded bf16 weights, padded f32 biases).
    """
    w1p, b1p, w2p, b2p = params

    x2d = jnp.asarray(x, jnp.float32)
    if x2d.ndim != 2:
        x2d = x2d.reshape(1, IN_FEATURES)          # mimics x.view(1, 486)
    batch = x2d.shape[0]
    m_pad = max(M_MIN, ((batch + M_MIN - 1) // M_MIN) * M_MIN)

    x_pad = _pad2(x2d, m_pad, K_PAD).astype(jnp.bfloat16)

    out = pl.pallas_call(
        _mlp_kernel,
        out_shape=jax.ShapeDtypeStruct((m_pad, N_PAD), jnp.float32),
        in_specs=[
            pl.BlockSpec(memory_space=pltpu.VMEM),   # x   (Mp, 512)  bf16
            pl.BlockSpec(memory_space=pltpu.VMEM),   # w1  (512, 256) bf16
            pl.BlockSpec(memory_space=pltpu.VMEM),   # b1  (1, 256)   f32
            pl.BlockSpec(memory_space=pltpu.VMEM),   # w2  (256, 128) bf16
            pl.BlockSpec(memory_space=pltpu.VMEM),   # b2  (1, 128)   f32
        ],
        out_specs=pl.BlockSpec(memory_space=pltpu.VMEM),
    )(x_pad, w1p, b1p, w2p, b2p)

    return out[:batch, :OUT_FEATURES]


def _reference_f32(x, w1, b1, w2, b2):
    x2d = jnp.asarray(x, jnp.float32).reshape(1, IN_FEATURES)
    h = jnp.maximum(x2d @ w1 + b1[None, :], 0.0)
    return h @ w2 + b2[None, :]


def _reference_bf16(x, w1, b1, w2, b2):
    # Same numerics as the kernel (bf16 operands, f32 accumulation).
    x2d = jnp.asarray(x, jnp.float32).reshape(1, IN_FEATURES).astype(jnp.bfloat16)
    h = jnp.dot(x2d, w1.astype(jnp.bfloat16),
                preferred_element_type=jnp.float32) + b1[None, :]
    h = jnp.maximum(h, 0.0)
    y = jnp.dot(h.astype(jnp.bfloat16), w2.astype(jnp.bfloat16),
                preferred_element_type=jnp.float32) + b2[None, :]
    return y


if __name__ == "__main__":
    key = jax.random.PRNGKey(0)
    kx, k1, k2, k3, k4 = jax.random.split(key, 5)

    # Deterministic parameter init (uniform, mimicking nn.Linear's fan-in bound).
    bound1 = 1.0 / (IN_FEATURES ** 0.5)
    bound2 = 1.0 / (HIDDEN ** 0.5)
    w1 = jax.random.uniform(k1, (IN_FEATURES, HIDDEN), jnp.float32, -bound1, bound1)
    b1 = jax.random.uniform(k2, (HIDDEN,), jnp.float32, -bound1, bound1)
    w2 = jax.random.uniform(k3, (HIDDEN, OUT_FEATURES), jnp.float32, -bound2, bound2)
    b2 = jax.random.uniform(k4, (OUT_FEATURES,), jnp.float32, -bound2, bound2)

    # One-time prep: pad + bf16-cast the weights (cached across calls).
    params = prepare_params(w1, b1, w2, b2)

    # Example input consistent with view(1, 81*2*3): shape (81, 2, 3).
    x = jax.random.normal(kx, (81, 2, 3), jnp.float32)

    out = net_forward(x, params)
    jax.block_until_ready(out)
    assert out.shape == (1, OUT_FEATURES), out.shape

    # Tight check vs a bf16 reference with identical numerics.
    ref_bf16 = _reference_bf16(x, w1, b1, w2, b2)
    assert jnp.allclose(out, ref_bf16, atol=1e-2, rtol=1e-2), \
        "mismatch vs bf16 JAX reference"

    # Loose check vs the full-f32 reference (bf16 inputs -> relaxed tolerance).
    ref_f32 = _reference_f32(x, w1, b1, w2, b2)
    assert jnp.allclose(out, ref_f32, atol=5e-2, rtol=5e-2), \
        "mismatch vs f32 JAX reference"

    print("KERNEL_OK")
</pallas_src>

<mosaic_0001>
module attributes {stable_mosaic.version = 11 : i64} {
  func.func @_mlp_kernel(%arg0: memref<8x512xbf16, #tpu.memory_space<vmem>>, %arg1: memref<512x256xbf16, #tpu.memory_space<vmem>>, %arg2: memref<1x256xf32, #tpu.memory_space<vmem>>, %arg3: memref<256x128xbf16, #tpu.memory_space<vmem>>, %arg4: memref<1x128xf32, #tpu.memory_space<vmem>>, %arg5: memref<8x128xf32, #tpu.memory_space<vmem>>) attributes {dimension_semantics = [], scalar_prefetch = 0 : i64, scratch_operands = 0 : i64, tpu.core_type = #tpu.core_type<tc>} {
    %c0 = arith.constant 0 : index
    %c0_0 = arith.constant 0 : index
    %0 = vector.load %arg0[%c0, %c0_0] : memref<8x512xbf16, #tpu.memory_space<vmem>>, vector<8x512xbf16>
    %c0_1 = arith.constant 0 : index
    %c0_2 = arith.constant 0 : index
    %1 = vector.load %arg1[%c0_1, %c0_2] : memref<512x256xbf16, #tpu.memory_space<vmem>>, vector<512x256xbf16>
    %cst = arith.constant dense<0.000000e+00> : vector<8x256xf32>
    %2 = tpu.matmul %0, %1, %cst {dimension_numbers = #tpu.dot_dimension_numbers<[1], [0], [0], [1], [0, 0, 1, 1], [], []>} : vector<8x512xbf16>, vector<512x256xbf16>, vector<8x256xf32> -> vector<8x256xf32>
    %c0_3 = arith.constant 0 : index
    %c0_4 = arith.constant 0 : index
    %3 = vector.load %arg2[%c0_3, %c0_4] : memref<1x256xf32, #tpu.memory_space<vmem>>, vector<1x256xf32>
    %4 = vector.broadcast %3 : vector<1x256xf32> to vector<8x256xf32>
    %5 = arith.addf %2, %4 : vector<8x256xf32>
    %cst_5 = arith.constant 0.000000e+00 : f32
    %6 = vector.broadcast %cst_5 : f32 to vector<8x256xf32>
    %7 = arith.maximumf %5, %6 : vector<8x256xf32>
    %8 = arith.truncf %7 : vector<8x256xf32> to vector<8x256xbf16>
    %c0_6 = arith.constant 0 : index
    %c0_7 = arith.constant 0 : index
    %9 = vector.load %arg3[%c0_6, %c0_7] : memref<256x128xbf16, #tpu.memory_space<vmem>>, vector<256x128xbf16>
    %cst_8 = arith.constant dense<0.000000e+00> : vector<8x128xf32>
    %10 = tpu.matmul %8, %9, %cst_8 {dimension_numbers = #tpu.dot_dimension_numbers<[1], [0], [0], [1], [0, 0, 1, 1], [], []>} : vector<8x256xbf16>, vector<256x128xbf16>, vector<8x128xf32> -> vector<8x128xf32>
    %c0_9 = arith.constant 0 : index
    %c0_10 = arith.constant 0 : index
    %11 = vector.load %arg4[%c0_9, %c0_10] : memref<1x128xf32, #tpu.memory_space<vmem>>, vector<1x128xf32>
    %12 = vector.broadcast %11 : vector<1x128xf32> to vector<8x128xf32>
    %13 = arith.addf %10, %12 : vector<8x128xf32>
    %c0_11 = arith.constant 0 : index
    %c0_12 = arith.constant 0 : index
    %14 = vector.load %arg5[%c0_11, %c0_12] : memref<8x128xf32, #tpu.memory_space<vmem>>, vector<8x128xf32>
    tpu.vector_store %arg5[%c0_11, %c0_12], %13 {strides = array<i32>} : memref<8x128xf32, #tpu.memory_space<vmem>>, vector<8x128xf32>,
    return
  }
}

</mosaic_0001>

<bundles_post_ra>
// kernel: tpu_custom_call.1
= control target key start
LH: loop header
LB: loop body
LE: loop exit
PB: predicated region body
PF: predicated region fallthrough
CT: control target
= control target key end

     0   :  { %10 = vsyncpa [#allocation3], 0  ;;  %s1172_s0 = inlined_call_operand.hbm [shape: bf16[8,512], index: 0, kind: input, shape index: {}]   ;;  %s1173_s1 = inlined_call_operand.hbm [shape: bf16[512,256], index: 1, kind: input, shape index: {}]   ;;  %s1174_s2 = inlined_call_operand.vmem [shape: f32[1,256], index: 2, kind: input, shape index: {}]   ;;  %s1175_s3 = inlined_call_operand.hbm [shape: bf16[256,128], index: 3, kind: input, shape index: {}]   ;;  %s1176_s4 = inlined_call_operand.vmem [shape: f32[1,128], index: 4, kind: input, shape index: {}]   ;;  %s1177_s5 = inlined_call_operand.hbm [shape: f32[8,128], index: 5, kind: output, shape index: {}]  }
   0x1   :  { %11 = vsyncpa [#allocation6], 0 }
   0x2   :  { %12 = vsyncpa [#allocation4], 0  ;;  %s1080_s18 = smov [#allocation5]   ;;  %s986_s22 = scalar_lea.hbm %s1173_s1, 8192 }
   0x3   :  { %s28_s19 = sshll.u32 %s1080_s18, 4  ;;  %p987_p0 = scmp.ne.s32.totalorder %s1173_s1, %s986_s22  ;;  %s29_s19 = int_to_ptr.vmem [resolvable:$true] %s28_s19 }
   0x4   :  { %p990_p1 = scmp.lt.u32.totalorder %s986_s22, %s1173_s1 }
   0x6   :  { %p992_p2 = pnand %p990_p1, %p987_p0 }
   0x8   :  { %995 = shalt.err (!%p992_p2)
}
   0x9   :  { %s996_s27 = scalar_lea.vmem %s29_s19, 8192  ;;  %p1001_p4 = scmp.lt.s32.totalorder %s29_s19, %s29_s19 }
   0xa   :  { %p997_p3 = scmp.ne.s32.totalorder %s29_s19, %s996_s27  ;;  %p1002_p5 = scmp.lt.s32.totalorder %s996_s27, %s996_s27 }
   0xc   :  { %p1003_p6 = por %p1002_p5, %p1001_p4 }
   0xe   :  { %p1004_p7 = pnand %p1003_p6, %p997_p3 }
  0x10   :  { %1007 = shalt.err (!%p1004_p7)
}
  0x11   :  { %s1081_s28 = smov 128   ;;  %s1082_s29 = smov 8  }
  0x12   :  { %34 = dma.hbm_to_vmem [thread:$0]  %s1173_s1, 8192, %s29_s19, [#allocation6], %s1081_s28, %s1081_s28, %s1082_s29  }
  0x13   :  { %s1083_s7 = smov [#allocation2]   ;;  %s1084_s9 = smov [#allocation7]  }
  0x14   :  { %s19_s8 = sshll.u32 %s1083_s7, 4  ;;  %s42_s10 = sshll.u32 %s1084_s9, 4  ;;  %s20_s8 = int_to_ptr.vmem [resolvable:$true] %s19_s8  ;;  %s43_s10 = int_to_ptr.vmem [resolvable:$true] %s42_s10 }
  0x15   :  { %s1008_s13 = scalar_lea.hbm %s1172_s0, 256 }
  0x16   :  { %p1009_p8 = scmp.ne.s32.totalorder %s1172_s0, %s1008_s13  ;;  %p1012_p9 = scmp.lt.u32.totalorder %s1008_s13, %s1172_s0 }
  0x18   :  { %p1014_p10 = pnand %p1012_p9, %p1009_p8 }
  0x1a   :  { %1017 = shalt.err (!%p1014_p10)
}
  0x1b   :  { %s1018_s1 = scalar_lea.vmem %s20_s8, 256  ;;  %p1023_p12 = scmp.lt.s32.totalorder %s20_s8, %s20_s8 }
  0x1c   :  { %p1019_p11 = scmp.ne.s32.totalorder %s20_s8, %s1018_s1  ;;  %p1024_p13 = scmp.lt.s32.totalorder %s1018_s1, %s1018_s1 }
  0x1e   :  { %p1025_p0 = por %p1024_p13, %p1023_p12 }
  0x20   :  { %p1026_p1 = pnand %p1025_p0, %p1019_p11 }
  0x22   :  { %1029 = shalt.err (!%p1026_p1)
}
  0x23   :  { %22 = dma.hbm_to_vmem [thread:$0]  %s1172_s0, 256, %s20_s8, [#allocation3]  }
  0x24   :  { %s1030_s22 = scalar_lea.hbm %s1175_s3, 2048 }
  0x25   :  { %p1031_p2 = scmp.ne.s32.totalorder %s1175_s3, %s1030_s22  ;;  %p1034_p3 = scmp.lt.u32.totalorder %s1030_s22, %s1175_s3 }
  0x27   :  { %p1036_p4 = pnand %p1034_p3, %p1031_p2 }
  0x29   :  { %1039 = shalt.err (!%p1036_p4)
}
  0x2a   :  { %s1040_s27 = scalar_lea.vmem %s43_s10, 2048  ;;  %p1045_p6 = scmp.lt.s32.totalorder %s43_s10, %s43_s10 }
  0x2b   :  { %p1041_p5 = scmp.ne.s32.totalorder %s43_s10, %s1040_s27  ;;  %p1046_p7 = scmp.lt.s32.totalorder %s1040_s27, %s1040_s27 }
  0x2d   :  { %p1047_p8 = por %p1046_p7, %p1045_p6 }
  0x2f   :  { %p1048_p9 = pnand %p1047_p8, %p1041_p5 }
  0x31   :  { %1051 = shalt.err (!%p1048_p9)
}
  0x32   :  { %s1085_s0 = smov 64   ;;  %s1086_s28 = smov 4  }
  0x33   :  { %48 = dma.hbm_to_vmem [thread:$0]  %s1175_s3, 2048, %s43_s10, [#allocation6], %s1085_s0, %s1085_s0, %s1086_s28  }
  0x34   :  { %1074 = dma.done.wait [#allocation3], 256  }
  0x35   :  { %1075 = vsyncadd [#allocation3], 4294967040 }
  0x36   :  { %1076 = dma.done.wait [#allocation6], 10240  }
  0x37   :  { %1077 = vsyncadd [#allocation6], 4294957056  ;;  %v870_v0 = vld [vmem:[#allocation5 + $0x4] ss:$8 sps:$4 sm:$0xff]   ;;  %v874_v2 = vld [vmem:[#allocation5] ss:$8 sps:$4 sm:$0xff]  }
  0x38   :  { %v872_v1 = vld [vmem:[#allocation5 + $0x104] ss:$8 sps:$4 sm:$0xff]   ;;  %473 = vmatprep.subr.bf16.mxu1 %v870_v0  ;;  %v875_v3 = vld [vmem:[#allocation5 + $0x100] ss:$8 sps:$4 sm:$0xff]   ;;  %v876_v4 = vld [vmem:[#allocation5 + $0x14] ss:$8 sps:$4 sm:$0xff]  }
  0x39   :  { %514 = vmatprep.subr.bf16.mxu0 %v872_v1  ;;  %474 = vmatpush1.bf16.msra.mxu1 %v874_v2  ;;  %v878_v5 = vld [vmem:[#allocation5 + $0x114] ss:$8 sps:$4 sm:$0xff]   ;;  %v880_v6 = vld [vmem:[#allocation5 + $0x10] ss:$8 sps:$4 sm:$0xff]   ;;  %v882_v8 = vld [vmem:[#allocation5 + $0x24] ss:$8 sps:$4 sm:$0xff]  }
  0x3a   :  { %515 = vmatpush1.bf16.msra.mxu0 %v875_v3  ;;  %475 = vmatprep.subr.bf16.mxu1 %v876_v4  ;;  %v881_v7 = vld [vmem:[#allocation5 + $0x110] ss:$8 sps:$4 sm:$0xff]   ;;  %v884_v9 = vld [vmem:[#allocation5 + $0x124] ss:$8 sps:$4 sm:$0xff]   ;;  %v886_v10 = vld [vmem:[#allocation5 + $0x20] ss:$8 sps:$4 sm:$0xff]  }
  0x3b   :  { %516 = vmatprep.subr.bf16.mxu0 %v878_v5  ;;  %v887_v11 = vld [vmem:[#allocation5 + $0x120] ss:$8 sps:$4 sm:$0xff]   ;;  %v888_v12 = vld [vmem:[#allocation5 + $0x34] ss:$8 sps:$4 sm:$0xff]   ;;  %v892_v14 = vld [vmem:[#allocation5 + $0x30] ss:$8 sps:$4 sm:$0xff]  }
  0x3c   :  { %v890_v13 = vld [vmem:[#allocation5 + $0x134] ss:$8 sps:$4 sm:$0xff]   ;;  %v893_v15 = vld [vmem:[#allocation5 + $0x130] ss:$8 sps:$4 sm:$0xff]   ;;  %v894_v16 = vld [vmem:[#allocation5 + $0x44] ss:$8 sps:$4 sm:$0xff]  }
  0x3d   :  { %476 = vmatpush1.bf16.msra.mxu1 %v880_v6  ;;  %v896_v17 = vld [vmem:[#allocation5 + $0x144] ss:$8 sps:$4 sm:$0xff]   ;;  %v898_v18 = vld [vmem:[#allocation5 + $0x40] ss:$8 sps:$4 sm:$0xff]   ;;  %v900_v20 = vld [vmem:[#allocation5 + $0x54] ss:$8 sps:$4 sm:$0xff]  }
  0x3e   :  { %517 = vmatpush1.bf16.msra.mxu0 %v881_v7  ;;  %477 = vmatprep.subr.bf16.mxu1 %v882_v8  ;;  %v899_v19 = vld [vmem:[#allocation5 + $0x140] ss:$8 sps:$4 sm:$0xff]   ;;  %v902_v21 = vld [vmem:[#allocation5 + $0x154] ss:$8 sps:$4 sm:$0xff]   ;;  %v904_v22 = vld [vmem:[#allocation5 + $0x50] ss:$8 sps:$4 sm:$0xff]  }
  0x3f   :  { %518 = vmatprep.subr.bf16.mxu0 %v884_v9  ;;  %v905_v23 = vld [vmem:[#allocation5 + $0x150] ss:$8 sps:$4 sm:$0xff]   ;;  %v906_v24 = vld [vmem:[#allocation5 + $0x64] ss:$8 sps:$4 sm:$0xff]   ;;  %v910_v26 = vld [vmem:[#allocation5 + $0x60] ss:$8 sps:$4 sm:$0xff]  }
  0x40   :  { %v908_v25 = vld [vmem:[#allocation5 + $0x164] ss:$8 sps:$4 sm:$0xff]   ;;  %v911_v27 = vld [vmem:[#allocation5 + $0x160] ss:$8 sps:$4 sm:$0xff]   ;;  %v912_v28 = vld [vmem:[#allocation5 + $0x74] ss:$8 sps:$4 sm:$0xff]  }
  0x41   :  { %478 = vmatpush1.bf16.msra.mxu1 %v886_v10  ;;  %v914_v29 = vld [vmem:[#allocation5 + $0x174] ss:$8 sps:$4 sm:$0xff]   ;;  %v916_v30 = vld [vmem:[#allocation5 + $0x70] ss:$8 sps:$4 sm:$0xff]   ;;  %v918_v32 = vld [vmem:[#allocation5 + $0x84] ss:$8 sps:$4 sm:$0xff]  }
  0x42   :  { %519 = vmatpush1.bf16.msra.mxu0 %v887_v11  ;;  %479 = vmatprep.subr.bf16.mxu1 %v888_v12  ;;  %v917_v31 = vld [vmem:[#allocation5 + $0x170] ss:$8 sps:$4 sm:$0xff]   ;;  %v920_v33 = vld [vmem:[#allocation5 + $0x184] ss:$8 sps:$4 sm:$0xff]   ;;  %v922_v34 = vld [vmem:[#allocation5 + $0x80] ss:$8 sps:$4 sm:$0xff]  }
  0x43   :  { %520 = vmatprep.subr.bf16.mxu0 %v890_v13  ;;  %v923_v35 = vld [vmem:[#allocation5 + $0x180] ss:$8 sps:$4 sm:$0xff]   ;;  %v924_v36 = vld [vmem:[#allocation5 + $0x94] ss:$8 sps:$4 sm:$0xff]   ;;  %v928_v38 = vld [vmem:[#allocation5 + $0x90] ss:$8 sps:$4 sm:$0xff]  }
  0x44   :  { %v926_v37 = vld [vmem:[#allocation5 + $0x194] ss:$8 sps:$4 sm:$0xff]   ;;  %v929_v39 = vld [vmem:[#allocation5 + $0x190] ss:$8 sps:$4 sm:$0xff]   ;;  %v930_v40 = vld [vmem:[#allocation5 + $0xa4] ss:$8 sps:$4 sm:$0xff]  }
  0x45   :  { %480 = vmatpush1.bf16.msra.mxu1 %v892_v14  ;;  %v932_v41 = vld [vmem:[#allocation5 + $0x1a4] ss:$8 sps:$4 sm:$0xff]   ;;  %v934_v42 = vld [vmem:[#allocation5 + $0xa0] ss:$8 sps:$4 sm:$0xff]   ;;  %v936_v44 = vld [vmem:[#allocation5 + $0xb4] ss:$8 sps:$4 sm:$0xff]  }
  0x46   :  { %521 = vmatpush1.bf16.msra.mxu0 %v893_v15  ;;  %481 = vmatprep.subr.bf16.mxu1 %v894_v16  ;;  %v935_v43 = vld [vmem:[#allocation5 + $0x1a0] ss:$8 sps:$4 sm:$0xff]   ;;  %v938_v45 = vld [vmem:[#allocation5 + $0x1b4] ss:$8 sps:$4 sm:$0xff]   ;;  %v940_v46 = vld [vmem:[#allocation5 + $0xb0] ss:$8 sps:$4 sm:$0xff]  }
  0x47   :  { %522 = vmatprep.subr.bf16.mxu0 %v896_v17  ;;  %v941_v47 = vld [vmem:[#allocation5 + $0x1b0] ss:$8 sps:$4 sm:$0xff]   ;;  %v942_v51 = vld [vmem:[#allocation5 + $0xc4] ss:$8 sps:$4 sm:$0xff]   ;;  %v946_v54 = vld [vmem:[#allocation5 + $0xc0] ss:$8 sps:$4 sm:$0xff]  }
  0x48   :  { %v61_v48 = vld [vmem:[#allocation2] sm:$0xff]  ;;  %v62_v50 = vld [vmem:[#allocation2 + $0x8] sm:$0xff]  ;;  %v944_v53 = vld [vmem:[#allocation5 + $0x1c4] ss:$8 sps:$4 sm:$0xff]   ;;  %s1087_s8 = smov [#allocation8]  }
  0x49   :  { %482 = vmatpush1.bf16.msra.mxu1 %v898_v18  ;;  %v752_v49 = vcombine.high %v61_v48, %v61_v48  ;;  %v754_v52 = vcombine.high %v62_v50, %v62_v50  ;;  %v947_v55 = vld [vmem:[#allocation5 + $0x1c0] ss:$8 sps:$4 sm:$0xff]   ;;  %v948_v56 = vld [vmem:[#allocation5 + $0xd4] ss:$8 sps:$4 sm:$0xff]   ;;  %v952_v58 = vld [vmem:[#allocation5 + $0xd0] ss:$8 sps:$4 sm:$0xff]   ;;  %v751_v5 = vcombine.low %v61_v48, %v61_v48  ;;  %v753_v6 = vcombine.low %v62_v50, %v62_v50 }
  0x4a   :  { %523 = vmatpush1.bf16.msra.mxu0 %v899_v19  ;;  %483 = vmatprep.subr.bf16.mxu1 %v900_v20  ;;  %v950_v57 = vld [vmem:[#allocation5 + $0x1d4] ss:$8 sps:$4 sm:$0xff]   ;;  %v953_v59 = vld [vmem:[#allocation5 + $0x1d0] ss:$8 sps:$4 sm:$0xff]   ;;  %v954_v60 = vld [vmem:[#allocation5 + $0xe4] ss:$8 sps:$4 sm:$0xff]  }
  0x4b   :  { %524 = vmatprep.subr.bf16.mxu0 %v902_v21  ;;  %505 = vmatprep.mubr.bf16.mxu1 %v752_v49  ;;  %v956_v61 = vld [vmem:[#allocation5 + $0x1e4] ss:$8 sps:$4 sm:$0xff]   ;;  %v958_v62 = vld [vmem:[#allocation5 + $0xe0] ss:$8 sps:$4 sm:$0xff]   ;;  %v960_v0 = vld [vmem:[#allocation5 + $0xf4] ss:$8 sps:$4 sm:$0xff]  }
  0x4c   :  { %546 = vmatprep.mubr.bf16.mxu0 %v754_v52  ;;  %v959_v63 = vld [vmem:[#allocation5 + $0x1e0] ss:$8 sps:$4 sm:$0xff]   ;;  %v962_v1 = vld [vmem:[#allocation5 + $0x1f4] ss:$8 sps:$4 sm:$0xff]   ;;  %v964_v2 = vld [vmem:[#allocation5 + $0xf0] ss:$8 sps:$4 sm:$0xff]  }
  0x4d   :  { %484 = vmatpush1.bf16.msra.mxu1 %v904_v22  ;;  %v965_v3 = vld [vmem:[#allocation5 + $0x1f0] ss:$8 sps:$4 sm:$0xff]   ;;  %v970_v4 = vld [vmem:[#allocation7 + $0x40] sm:$0xff]   ;;  %v972_v8 = vld [vmem:[#allocation7 + $0x48] sm:$0xff]   ;;  %v129_v22 = vlaneseq  ;;  %s741_s9 = sshll.u32 %s1087_s8, 4  ;;  %s742_s9 = int_to_ptr.vmem [resolvable:$true] %s741_s9 }
  0x4e   :  { %525 = vmatpush1.bf16.msra.mxu0 %v905_v23  ;;  %485 = vmatprep.subr.bf16.mxu1 %v906_v24  ;;  %v971_v7 = vld [vmem:[#allocation7] sm:$0xff]   ;;  %v973_v9 = vld [vmem:[#allocation7 + $0x8] sm:$0xff]   ;;  %v974_v10 = vld [vmem:[#allocation7 + $0x50] sm:$0xff]   ;;  %s1052_s10 = scalar_lea.vmem %s742_s9, 128  ;;  %p1057_p11 = scmp.lt.s32.totalorder %s742_s9, %s742_s9 }
  0x4f   :  { %526 = vmatprep.subr.bf16.mxu0 %v908_v25  ;;  %v975_v11 = vld [vmem:[#allocation7 + $0x10] sm:$0xff]   ;;  %v976_v12 = vld [vmem:[#allocation7 + $0x58] sm:$0xff]   ;;  %v978_v14 = vld [vmem:[#allocation7 + $0x60] sm:$0xff]   ;;  %v130_v23 = vshrl.u32 %v129_v22, 7  ;;  %p1053_p10 = scmp.ne.s32.totalorder %s742_s9, %s1052_s10  ;;  %p1058_p12 = scmp.lt.s32.totalorder %s1052_s10, %s1052_s10 }
  0x50   :  { %v977_v13 = vld [vmem:[#allocation7 + $0x18] sm:$0xff]   ;;  %v979_v15 = vld [vmem:[#allocation7 + $0x20] sm:$0xff]   ;;  %v980_v16 = vld [vmem:[#allocation7 + $0x68] sm:$0xff]  }
  0x51   :  { %486 = vmatpush1.bf16.msra.mxu1 %v910_v26  ;;  %v981_v17 = vld [vmem:[#allocation7 + $0x28] sm:$0xff]   ;;  %v982_v18 = vld [vmem:[#allocation7 + $0x70] sm:$0xff]   ;;  %v984_v20 = vld [vmem:[#allocation7 + $0x78] sm:$0xff]   ;;  %v131_v24 = vsub.s32 0, %v130_v23  ;;  %v135_v26 = vsub.s32 1, %v130_v23  ;;  %p1059_p13 = por %p1058_p12, %p1057_p11 }
  0x52   :  { %527 = vmatpush1.bf16.msra.mxu0 %v911_v27  ;;  %487 = vmatprep.subr.bf16.mxu1 %v912_v28  ;;  %v983_v19 = vld [vmem:[#allocation7 + $0x30] sm:$0xff]   ;;  %v985_v21 = vld [vmem:[#allocation7 + $0x38] sm:$0xff]  }
  0x53   :  { %528 = vmatprep.subr.bf16.mxu0 %v914_v29  ;;  %v127_v25 = vld [vmem:[%s1174_s2] sm:$0x3]  ;;  %p1060_p0 = pnand %p1059_p13, %p1053_p10 }
  0x54   :  { %v132_v27 = vrot.slane %v127_v25, %v131_v24  ;;  %v136_v28 = vrot.slane %v127_v25, %v135_v26 }
  0x55   :  { %488 = vmatpush1.bf16.msra.mxu1 %v916_v30 }
  0x56   :  { %529 = vmatpush1.bf16.msra.mxu0 %v917_v31  ;;  %489 = vmatprep.subr.bf16.mxu1 %v918_v32 }
  0x57   :  { %530 = vmatprep.subr.bf16.mxu0 %v920_v33 }
  0x59   :  { %490 = vmatpush1.bf16.msra.mxu1 %v922_v34 }
  0x5a   :  { %531 = vmatpush1.bf16.msra.mxu0 %v923_v35  ;;  %491 = vmatprep.subr.bf16.mxu1 %v924_v36 }
  0x5b   :  { %532 = vmatprep.subr.bf16.mxu0 %v926_v37 }
  0x5d   :  { %492 = vmatpush1.bf16.msra.mxu1 %v928_v38 }
  0x5e   :  { %533 = vmatpush1.bf16.msra.mxu0 %v929_v39  ;;  %493 = vmatprep.subr.bf16.mxu1 %v930_v40 }
  0x5f   :  { %534 = vmatprep.subr.bf16.mxu0 %v932_v41 }
  0x61   :  { %494 = vmatpush1.bf16.msra.mxu1 %v934_v42 }
  0x62   :  { %535 = vmatpush1.bf16.msra.mxu0 %v935_v43  ;;  %495 = vmatprep.subr.bf16.mxu1 %v936_v44 }
  0x63   :  { %536 = vmatprep.subr.bf16.mxu0 %v938_v45 }
  0x65   :  { %496 = vmatpush1.bf16.msra.mxu1 %v940_v46  ;;  %v819_v46 = vld [vmem:[%s1176_s4] ss:$0 sm:$0xff] }
  0x66   :  { %537 = vmatpush1.bf16.msra.mxu0 %v941_v47  ;;  %497 = vmatprep.subr.bf16.mxu1 %v942_v51 }
  0x67   :  { %538 = vmatprep.subr.bf16.mxu0 %v944_v53 }
  0x69   :  { %498 = vmatpush1.bf16.msra.mxu1 %v946_v54 }
  0x6a   :  { %539 = vmatpush1.bf16.msra.mxu0 %v947_v55  ;;  %499 = vmatprep.subr.bf16.mxu1 %v948_v56 }
  0x6b   :  { %540 = vmatprep.subr.bf16.mxu0 %v950_v57 }
  0x6d   :  { %500 = vmatpush1.bf16.msra.mxu1 %v952_v58 }
  0x6e   :  { %541 = vmatpush1.bf16.msra.mxu0 %v953_v59  ;;  %501 = vmatprep.subr.bf16.mxu1 %v954_v60 }
  0x6f   :  { %542 = vmatprep.subr.bf16.mxu0 %v956_v61 }
  0x71   :  { %502 = vmatpush1.bf16.msra.mxu1 %v958_v62 }
  0x72   :  { %543 = vmatpush1.bf16.msra.mxu0 %v959_v63  ;;  %503 = vmatprep.subr.bf16.mxu1 %v960_v0 }
  0x73   :  { %544 = vmatprep.subr.bf16.mxu0 %v962_v1 }
  0x75   :  { %504 = vmatpush1.bf16.msra.mxu1 %v964_v2 }
  0x76   :  { %545 = vmatpush1.bf16.msra.mxu0 %v965_v3  ;;  %836 = vmatprep.subr.bf16.mxu1 %v970_v4 }
  0x78   :  { %506 = vmatmul.mubr.bf16.vlgmr.msra.gmra.mrb[0].mxu1 %v751_v5 }
  0x79   :  { %547 = vmatmul.mubr.bf16.vlgmr.msra.gmra.mrb[0].mxu0 %v753_v6  ;;  %837 = vmatpush3.bf16.msra.mxu1 %v971_v7 }
  0x7a   :  { %838 = vmatprep.subr.bf16.mxu1 %v972_v8 }
  0x7d   :  { %839 = vmatpush3.bf16.msra.mxu1 %v973_v9 }
  0x7e   :  { %840 = vmatprep.subr.bf16.mxu1 %v974_v10 }
  0x81   :  { %841 = vmatpush3.bf16.msra.mxu1 %v975_v11 }
  0x82   :  { %842 = vmatprep.subr.bf16.mxu1 %v976_v12 }
  0x85   :  { %843 = vmatpush3.bf16.msra.mxu1 %v977_v13 }
  0x86   :  { %844 = vmatprep.subr.bf16.mxu1 %v978_v14 }
  0x89   :  { %845 = vmatpush3.bf16.msra.mxu1 %v979_v15 }
  0x8a   :  { %846 = vmatprep.subr.bf16.mxu1 %v980_v16 }
  0x8d   :  { %847 = vmatpush3.bf16.msra.mxu1 %v981_v17 }
  0x8e   :  { %848 = vmatprep.subr.bf16.mxu1 %v982_v18 }
  0x91   :  { %849 = vmatpush3.bf16.msra.mxu1 %v983_v19 }
  0x92   :  { %850 = vmatprep.subr.bf16.mxu1 %v984_v20 }
  0x95   :  { %851 = vmatpush3.bf16.msra.mxu1 %v985_v21 }
 0x14b   :  { %v507_v29 = vpop.f32.mrb[0].mxu1 }
 0x14c   :  { %v548_v30 = vpop.f32.mrb[0].mxu0  ;;  %v508_v31 = vadd.f32 %v507_v29, %v132_v27  ;;  %v509_v32 = vpop.f32.mrb[1].mxu1 }
 0x14d   :  { %v550_v33 = vpop.f32.mrb[1].mxu0  ;;  %v510_v34 = vadd.f32 %v509_v32, %v136_v28  ;;  %v511_v35 = vpop.f32.mrb[2].mxu1 }
 0x14e   :  { %v552_v36 = vpop.f32.mrb[2].mxu0  ;;  %v549_v37 = vadd.f32 %v548_v30, %v508_v31  ;;  %v512_v38 = vpop.f32.mrb[3].mxu1 }
 0x14f   :  { %v553_v39 = vpop.f32.mrb[3].mxu0  ;;  %v551_v40 = vadd.f32 %v550_v33, %v510_v34 }
 0x150   :  { %v555_v41 = vmax.f32 %v549_v37, 0.0 }
 0x151   :  { %v556_v42 = vmax.f32 %v551_v40, 0.0 }
 0x152   :  { %v557_v44 = vpack.c.bf16 %v555_v41, %v555_v41 }
 0x153   :  { %v558_v43 = vpack.c.bf16 %v556_v42, %v556_v42 }
 0x155   :  { %726 = vmatprep.mubr.bf16.mxu1 %v558_v43 }
 0x156   :  { %727 = vmatmul.mubr.bf16.vlgmr.msra.gmra.mrb[4].mxu1 %v557_v44 }
 0x229   :  { %v852_v45 = vpop.f32.mrb[4].mxu1 }
 0x22a   :  { %v853_v47 = vpop.f32.mrb[5].mxu1 }
 0x22b   :  { %v854_v48 = vadd.f32 %v853_v47, %v852_v45  ;;  %v855_v49 = vpop.f32.mrb[6].mxu1 }
 0x22c   :  { %v856_v50 = vpop.f32.mrb[7].mxu1 }
 0x22d   :  { %v729_v51 = vadd.f32 %v854_v48, %v819_v46 }
 0x22f   :  { %734 = vst [vmem:[#allocation8] sm:$0xff] %v729_v51 }
 0x230   :  { %1063 = shalt.err (!%p1060_p0)
}
 0x231   :  { %s1064_s4 = scalar_lea.hbm %s1177_s5, 128 }
 0x232   :  { %p1065_p1 = scmp.ne.s32.totalorder %s1177_s5, %s1064_s4  ;;  %p1068_p2 = scmp.lt.u32.totalorder %s1064_s4, %s1177_s5 }
 0x234   :  { %p1070_p3 = pnand %p1068_p2, %p1065_p1 }
 0x236   :  { %1073 = shalt.err (!%p1070_p3)
}
 0x237   :  { %744 = dma.vmem_to_hbm [thread:$0]  %s742_s9, 128, %s1177_s5, [#allocation4]  }
 0x238   :  { %1078 = dma.done.wait [#allocation4], 128  }
 0x239   :  { %1079 = vsyncadd [#allocation4], 4294967168 }
 0x23a   :  { %748 = vsyncpa [#allocation3], 1 }
 0x23b   :  { %749 = vsyncpa [#allocation6], 1 }
 0x23c   :  { %750 = vsyncpa [#allocation4], 1 }

</bundles_post_ra>
